<compile_context>
chip_gen: v6e
topology: v6e:2x2x1
jax: 0.10.0
libtpu: 0.0.40
codegen_flags: <defaults>
</compile_context>

<pallas_src>
import functools

import jax
import jax.numpy as jnp
from jax.experimental import pallas as pl
from jax.experimental.pallas import tpu as pltpu

LANE = 128
SUBLANE = 8
MIN_BATCH_TILE = 16  # bf16 packs 16 rows per sublane group


def _round_up(x, m):
    return ((x + m - 1) // m) * m


# ----------------------------------------------------------------------------
# Kernels
# ----------------------------------------------------------------------------
def _mlp_resident_kernel(x_ref, w1_ref, b1_ref, w2_ref, b2_ref, o_ref):
    # In-kernel cast of the activation tile (VPU work hidden under the MXU).
    x = x_ref[...].astype(w1_ref.dtype)
    h = jnp.dot(x, w1_ref[...], preferred_element_type=jnp.float32)
    h = jnp.maximum(h + b1_ref[...], 0.0)                 # bias + ReLU in f32
    y = jnp.dot(h.astype(w2_ref.dtype), w2_ref[...],
                preferred_element_type=jnp.float32)
    o_ref[...] = (y + b2_ref[...]).astype(o_ref.dtype)


def _mlp_stream_kernel(x_ref, w1_ref, b1_ref, w2_ref, b2_ref, o_ref, acc_ref):
    # Streams the embed dimension in slabs; accumulates the second matmul in f32.
    e = pl.program_id(1)

    @pl.when(e == 0)
    def _():
        acc_ref[...] = jnp.zeros_like(acc_ref)

    x = x_ref[...].astype(w1_ref.dtype)
    h = jnp.dot(x, w1_ref[...], preferred_element_type=jnp.float32)
    h = jnp.maximum(h + b1_ref[...], 0.0)
    acc_ref[...] += jnp.dot(h.astype(w2_ref.dtype), w2_ref[...],
                            preferred_element_type=jnp.float32)

    @pl.when(e == pl.num_programs(1) - 1)
    def _():
        o_ref[...] = (acc_ref[...] + b2_ref[...]).astype(o_ref.dtype)


# ----------------------------------------------------------------------------
# Parameter prep (one-time; NOT per forward call)
# ----------------------------------------------------------------------------
def prepare_params(w1, b1, w2, b2, compute_dtype=jnp.bfloat16):
    """PyTorch layout in: w1 [embed, in], b1 [embed], w2 [out, embed], b2 [out].
    Returns transposed ([in, out]) weights padded to 128-lane multiples, cast to
    the MXU compute dtype; biases padded, kept in f32 as (1, N) rows."""
    in_dim, embed_dim, out_dim = w1.shape[1], w1.shape[0], w2.shape[0]
    in_p = _round_up(in_dim, LANE)
    emb_p = _round_up(embed_dim, LANE)
    out_p = _round_up(out_dim, LANE)

    w1_t = jnp.zeros((in_p, emb_p), compute_dtype)
    w1_t = w1_t.at[:in_dim, :embed_dim].set(w1.T.astype(compute_dtype))
    w2_t = jnp.zeros((emb_p, out_p), compute_dtype)
    w2_t = w2_t.at[:embed_dim, :out_dim].set(w2.T.astype(compute_dtype))
    b1_p = jnp.zeros((1, emb_p), jnp.float32).at[0, :embed_dim].set(
        b1.astype(jnp.float32))
    b2_p = jnp.zeros((1, out_p), jnp.float32).at[0, :out_dim].set(
        b2.astype(jnp.float32))
    return w1_t, b1_p, w2_t, b2_p


# ----------------------------------------------------------------------------
# VMEM budgeting / tiling plan
# ----------------------------------------------------------------------------
@functools.lru_cache(maxsize=1)
def _vmem_budget():
    """(tile-selection budget, vmem_limit_bytes) derived per TPU generation."""
    try:
        cap = int(pltpu.get_tpu_info().vmem_capacity_bytes)
    except Exception:
        cap = 64 << 20  # conservative: v7x per-TensorCore VMEM
    vmem_limit = min(int(cap * 0.85), 112 << 20)
    return vmem_limit - (2 << 20), vmem_limit


def _resident_block_spec(shape, index_map):
    """Single-buffer blocks whose index_map is constant (never re-DMA'd):
    halves their VMEM footprint vs. the default double-buffering."""
    try:
        return pl.BlockSpec(shape, index_map, pipeline_mode=pl.Buffered(1))
    except Exception:  # older jax without pipeline_mode / Buffered(1)
        return pl.BlockSpec(shape, index_map)


def _choose_batch_tile(b, in_p, emb, out_p, x_isz, out_isz, weight_bytes, budget):
    """Largest batch tile whose double-buffered activation tiles + live
    intermediates + the given weight footprint fit in the VMEM budget, with
    bounded batch-padding waste and enough grid steps for both v7x cores."""
    b16 = _round_up(b, MIN_BATCH_TILE)
    best = MIN_BATCH_TILE
    for tb in (512, 256, 128, 64, 32, 16):
        if tb > b16:
            continue
        b_pad = _round_up(b16, tb)
        # Bound batch-padding waste to ~12.5% (always allow the smallest tile).
        if tb > MIN_BATCH_TILE and (b_pad - b16) * 8 > b16:
            continue
        act = 2 * tb * (in_p * x_isz + out_p * out_isz)      # double-buffered I/O tiles
        live = tb * (emb * 6 + out_p * 4)                    # f32 h + bf16 h + f32 acc
        if weight_bytes + act + live <= budget:
            best = tb
            break
    # Feed both v7x TensorCores / give the pipeline prologue-epilogue overlap,
    # while keeping tb >= 256 (full MXU M occupancy on v6e/v7x).
    while best > 256 and _round_up(b16, best) // best < 4:
        best //= 2
    return best


def _plan(b, in_p, emb_p, out_p, x_isz, out_isz, w_isz, budget, emb_tile):
    """Returns (batch_tile, emb_tile_or_None). None => resident-weight path."""
    resident_w = (in_p * emb_p + emb_p * out_p) * w_isz + (emb_p + out_p) * 4
    if emb_tile is None and resident_w <= budget // 2:
        tb = _choose_batch_tile(b, in_p, emb_p, out_p, x_isz, out_isz,
                                resident_w, budget)
        return tb, None

    # Streaming path: pick an emb slab (multiple of 128 dividing emb_p) whose
    # double-buffered weight slabs use at most half the budget.
    if emb_tile is None:
        divisors = [d for d in range(LANE, emb_p + 1, LANE) if emb_p % d == 0]
        emb_tile = LANE
        for d in sorted(divisors, reverse=True):
            if 2 * d * (in_p + out_p) * w_isz <= budget // 2:
                emb_tile = d
                break
    if emb_tile % LANE != 0 or emb_p % emb_tile != 0:
        raise ValueError(f"emb_tile={emb_tile} must be a multiple of {LANE} "
                         f"dividing the padded embed dim {emb_p}")
    slab_w = (2 * emb_tile * (in_p + out_p) * w_isz   # double-buffered w1/w2 slabs
              + 2 * emb_tile * 4 + out_p * 4)          # b1 slabs + resident b2
    tb = _choose_batch_tile(b, in_p, emb_tile, out_p, x_isz, out_isz,
                            slab_w, budget)
    return tb, emb_tile


# ----------------------------------------------------------------------------
# Forward
# ----------------------------------------------------------------------------
@functools.partial(jax.jit, static_argnames=("out_dim", "emb_tile", "out_dtype"))
def mlp_forward(x, w1_t, b1_p, w2_t, b2_p, *, out_dim, emb_tile=None,
                out_dtype=None):
    """x: [B, input_dim]; params from prepare_params. Returns [B, out_dim]."""
    B, in_dim = x.shape
    in_p, emb_p = w1_t.shape
    out_p = w2_t.shape[1]
    compute_dtype = w1_t.dtype
    out_dtype = jnp.dtype(out_dtype) if out_dtype is not None else x.dtype

    w_isz = jnp.dtype(compute_dtype).itemsize
    x_isz = x.dtype.itemsize
    out_isz = jnp.dtype(out_dtype).itemsize

    budget, vmem_limit = _vmem_budget()
    tb, et = _plan(B, in_p, emb_p, out_p, x_isz, out_isz, w_isz, budget, emb_tile)
    B_pad = _round_up(B, tb)

    # Avoid the extra HBM round trip when x is already aligned: pass it through
    # untouched (the bf16 cast happens inside the kernel). Only zero-pad when
    # the shapes demand it (padded K rows / biases / batch rows are exact).
    if B_pad == B and in_dim == in_p:
        x_in = x
    else:
        x_in = jnp.zeros((B_pad, in_p), x.dtype).at[:B, :in_dim].set(x)

    flops = 2 * B_pad * (in_p * emb_p + emb_p * out_p)

    if et is None:
        grid = (B_pad // tb,)
        bytes_accessed = (B_pad * in_p * x_isz
                          + (w1_t.size + w2_t.size) * w_isz
                          + (b1_p.size + b2_p.size) * 4
                          + B_pad * out_p * out_isz)
        out_arr = pl.pallas_call(
            _mlp_resident_kernel,
            out_shape=jax.ShapeDtypeStruct((B_pad, out_p), out_dtype),
            grid=grid,
            in_specs=[
                pl.BlockSpec((tb, in_p), lambda i: (i, 0)),            # x tile, pipelined
                _resident_block_spec((in_p, emb_p), lambda i: (0, 0)),  # w1 resident, 1 buffer
                _resident_block_spec((1, emb_p), lambda i: (0, 0)),     # b1 resident
                _resident_block_spec((emb_p, out_p), lambda i: (0, 0)), # w2 resident
                _resident_block_spec((1, out_p), lambda i: (0, 0)),     # b2 resident
            ],
            out_specs=pl.BlockSpec((tb, out_p), lambda i: (i, 0)),
            compiler_params=pltpu.CompilerParams(
                dimension_semantics=("parallel",),   # shards batch across TCs on v7x
                vmem_limit_bytes=vmem_limit),
            cost_estimate=pl.CostEstimate(
                flops=flops, transcendentals=0, bytes_accessed=bytes_accessed),
        )(x_in, w1_t, b1_p, w2_t, b2_p)
    else:
        n_bt = B_pad // tb
        grid = (n_bt, emb_p // et)
        bytes_accessed = (B_pad * in_p * x_isz
                          + n_bt * (w1_t.size + w2_t.size) * w_isz
                          + n_bt * b1_p.size * 4 + b2_p.size * 4
                          + B_pad * out_p * out_isz)
        out_arr = pl.pallas_call(
            _mlp_stream_kernel,
            out_shape=jax.ShapeDtypeStruct((B_pad, out_p), out_dtype),
            grid=grid,
            in_specs=[
                pl.BlockSpec((tb, in_p), lambda i, e: (i, 0)),   # resident across e
                pl.BlockSpec((in_p, et), lambda i, e: (0, e)),   # w1 column slab
                pl.BlockSpec((1, et), lambda i, e: (0, e)),      # b1 slab
                pl.BlockSpec((et, out_p), lambda i, e: (e, 0)),  # w2 row slab
                _resident_block_spec((1, out_p), lambda i, e: (0, 0)),  # b2 resident
            ],
            out_specs=pl.BlockSpec((tb, out_p), lambda i, e: (i, 0)),
            scratch_shapes=[pltpu.VMEM((tb, out_p), jnp.float32)],
            compiler_params=pltpu.CompilerParams(
                dimension_semantics=("parallel", "arbitrary"),
                vmem_limit_bytes=vmem_limit),
            cost_estimate=pl.CostEstimate(
                flops=flops, transcendentals=0, bytes_accessed=bytes_accessed),
        )(x_in, w1_t, b1_p, w2_t, b2_p)

    return out_arr[:B, :out_dim]


# ----------------------------------------------------------------------------
# Demo / self-check
# ----------------------------------------------------------------------------
def init_linear_params(key, in_dim, out_dim):
    """Deterministic PyTorch-style init: U(-1/sqrt(fan_in), 1/sqrt(fan_in))."""
    k_w, k_b = jax.random.split(key)
    bound = 1.0 / (in_dim ** 0.5)
    w = jax.random.uniform(k_w, (out_dim, in_dim), jnp.float32, -bound, bound)
    b = jax.random.uniform(k_b, (out_dim,), jnp.float32, -bound, bound)
    return w, b


if __name__ == "__main__":
    key = jax.random.PRNGKey(0)
    k_x, k_l0, k_l1, k_x2, k_l2, k_l3 = jax.random.split(key, 6)

    # --- Case 1: small shapes -> resident-weight path ------------------------
    batch, input_dim, embed_dim, output_dim = 8, 16, 32, 8
    x = jax.random.normal(k_x, (batch, input_dim), jnp.float32)
    w1, b1 = init_linear_params(k_l0, input_dim, embed_dim)   # Linear(input_dim, embed_dim)
    w2, b2 = init_linear_params(k_l1, embed_dim, output_dim)  # Linear(embed_dim, output_dim)

    w1_t, b1_p, w2_t, b2_p = prepare_params(w1, b1, w2, b2)   # one-time prep
    out = mlp_forward(x, w1_t, b1_p, w2_t, b2_p, out_dim=output_dim)
    out = jax.block_until_ready(out)

    ref = jnp.maximum(x @ w1.T + b1, 0.0) @ w2.T + b2
    assert out.shape == (batch, output_dim)
    # bf16 matmul operands with f32 accumulation -> loosened tolerance.
    assert jnp.allclose(out, ref, atol=2e-2, rtol=2e-2), \
        float(jnp.max(jnp.abs(out - ref)))

    # --- Case 2: exercise the emb-streaming accumulator path -----------------
    batch2, in2, emb2, out2 = 32, 128, 256, 64
    x2 = jax.random.normal(k_x2, (batch2, in2), jnp.float32)
    w1b, b1b = init_linear_params(k_l2, in2, emb2)
    w2b, b2b = init_linear_params(k_l3, emb2, out2)
    p2 = prepare_params(w1b, b1b, w2b, b2b)
    out_s = mlp_forward(x2, *p2, out_dim=out2, emb_tile=128)  # forced streaming
    out_s = jax.block_until_ready(out_s)

    ref2 = jnp.maximum(x2 @ w1b.T + b1b, 0.0) @ w2b.T + b2b
    assert out_s.shape == (batch2, out2)
    assert jnp.allclose(out_s, ref2, atol=5e-2, rtol=5e-2), \
        float(jnp.max(jnp.abs(out_s - ref2)))

    print("KERNEL_OK")
</pallas_src>

<mosaic_0001>
module attributes {stable_mosaic.version = 11 : i64} {
  func.func @_mlp_resident_kernel(%arg0: i32, %arg1: memref<16x128xf32, #tpu.memory_space<vmem>>, %arg2: memref<128x128xbf16, #tpu.memory_space<vmem>>, %arg3: memref<1x128xf32, #tpu.memory_space<vmem>>, %arg4: memref<128x128xbf16, #tpu.memory_space<vmem>>, %arg5: memref<1x128xf32, #tpu.memory_space<vmem>>, %arg6: memref<16x128xf32, #tpu.memory_space<vmem>>) attributes {dimension_semantics = [#tpu.dimension_semantics<parallel>], iteration_bounds = array<i64: 1>, scalar_prefetch = 0 : i64, scratch_operands = 0 : i64, tpu.core_type = #tpu.core_type<tc>, window_params = [{transform_indices = @transform_0, window_bounds = array<i64: 16, 128>}, {pipeline_mode = #tpu.pipeline_mode<synchronous>, transform_indices = @transform_1, window_bounds = array<i64: 128, 128>}, {pipeline_mode = #tpu.pipeline_mode<synchronous>, transform_indices = @transform_2, window_bounds = array<i64: 1, 128>}, {pipeline_mode = #tpu.pipeline_mode<synchronous>, transform_indices = @transform_3, window_bounds = array<i64: 128, 128>}, {pipeline_mode = #tpu.pipeline_mode<synchronous>, transform_indices = @transform_4, window_bounds = array<i64: 1, 128>}, {transform_indices = @transform_5, window_bounds = array<i64: 16, 128>}]} {
    %c0 = arith.constant 0 : index
    %c0_0 = arith.constant 0 : index
    %0 = vector.load %arg1[%c0, %c0_0] : memref<16x128xf32, #tpu.memory_space<vmem>>, vector<16x128xf32>
    %1 = arith.truncf %0 : vector<16x128xf32> to vector<16x128xbf16>
    %c0_1 = arith.constant 0 : index
    %c0_2 = arith.constant 0 : index
    %2 = vector.load %arg2[%c0_1, %c0_2] : memref<128x128xbf16, #tpu.memory_space<vmem>>, vector<128x128xbf16>
    %cst = arith.constant dense<0.000000e+00> : vector<16x128xf32>
    %3 = tpu.matmul %1, %2, %cst {dimension_numbers = #tpu.dot_dimension_numbers<[1], [0], [0], [1], [0, 0, 1, 1], [], []>} : vector<16x128xbf16>, vector<128x128xbf16>, vector<16x128xf32> -> vector<16x128xf32>
    %c0_3 = arith.constant 0 : index
    %c0_4 = arith.constant 0 : index
    %4 = vector.load %arg3[%c0_3, %c0_4] : memref<1x128xf32, #tpu.memory_space<vmem>>, vector<1x128xf32>
    %5 = vector.broadcast %4 : vector<1x128xf32> to vector<16x128xf32>
    %6 = arith.addf %3, %5 : vector<16x128xf32>
    %cst_5 = arith.constant 0.000000e+00 : f32
    %7 = vector.broadcast %cst_5 : f32 to vector<16x128xf32>
    %8 = arith.maximumf %6, %7 : vector<16x128xf32>
    %9 = arith.truncf %8 : vector<16x128xf32> to vector<16x128xbf16>
    %c0_6 = arith.constant 0 : index
    %c0_7 = arith.constant 0 : index
    %10 = vector.load %arg4[%c0_6, %c0_7] : memref<128x128xbf16, #tpu.memory_space<vmem>>, vector<128x128xbf16>
    %cst_8 = arith.constant dense<0.000000e+00> : vector<16x128xf32>
    %11 = tpu.matmul %9, %10, %cst_8 {dimension_numbers = #tpu.dot_dimension_numbers<[1], [0], [0], [1], [0, 0, 1, 1], [], []>} : vector<16x128xbf16>, vector<128x128xbf16>, vector<16x128xf32> -> vector<16x128xf32>
    %c0_9 = arith.constant 0 : index
    %c0_10 = arith.constant 0 : index
    %12 = vector.load %arg5[%c0_9, %c0_10] : memref<1x128xf32, #tpu.memory_space<vmem>>, vector<1x128xf32>
    %13 = vector.broadcast %12 : vector<1x128xf32> to vector<16x128xf32>
    %14 = arith.addf %11, %13 : vector<16x128xf32>
    %c0_11 = arith.constant 0 : index
    %c0_12 = arith.constant 0 : index
    %15 = vector.load %arg6[%c0_11, %c0_12] : memref<16x128xf32, #tpu.memory_space<vmem>>, vector<16x128xf32>
    tpu.vector_store %arg6[%c0_11, %c0_12], %14 {strides = array<i32>} : memref<16x128xf32, #tpu.memory_space<vmem>>, vector<16x128xf32>,
    return
  }
  func.func @transform_0(%arg0: i32) -> (i32, i32) {
    %c0_i32 = arith.constant 0 : i32
    %c0_i32_0 = arith.constant 0 : i32
    return %arg0, %c0_i32 : i32, i32
  }
  func.func @transform_1(%arg0: i32) -> (i32, i32) {
    %c0_i32 = arith.constant 0 : i32
    %c0_i32_0 = arith.constant 0 : i32
    %c0_i32_1 = arith.constant 0 : i32
    return %c0_i32, %c0_i32_0 : i32, i32
  }
  func.func @transform_2(%arg0: i32) -> (i32, i32) {
    %c0_i32 = arith.constant 0 : i32
    %c0_i32_0 = arith.constant 0 : i32
    %c0_i32_1 = arith.constant 0 : i32
    return %c0_i32, %c0_i32_0 : i32, i32
  }
  func.func @transform_3(%arg0: i32) -> (i32, i32) {
    %c0_i32 = arith.constant 0 : i32
    %c0_i32_0 = arith.constant 0 : i32
    %c0_i32_1 = arith.constant 0 : i32
    return %c0_i32, %c0_i32_0 : i32, i32
  }
  func.func @transform_4(%arg0: i32) -> (i32, i32) {
    %c0_i32 = arith.constant 0 : i32
    %c0_i32_0 = arith.constant 0 : i32
    %c0_i32_1 = arith.constant 0 : i32
    return %c0_i32, %c0_i32_0 : i32, i32
  }
  func.func @transform_5(%arg0: i32) -> (i32, i32) {
    %c0_i32 = arith.constant 0 : i32
    %c0_i32_0 = arith.constant 0 : i32
    return %arg0, %c0_i32 : i32, i32
  }
}

</mosaic_0001>

<bundles_post_ra>
// kernel: mlp_forward.1
= control target key start
LH: loop header
LB: loop body
LE: loop exit
PB: predicated region body
PF: predicated region fallthrough
CT: control target
= control target key end

     0   :  { %10 = vsyncpa [#allocation3], 0  ;;  %s489_s0 = inlined_call_operand.vmem [shape: f32[16,128], index: 0, kind: input, shape index: {}]   ;;  %s490_s1 = inlined_call_operand.hbm [shape: bf16[128,128], index: 1, kind: input, shape index: {}]   ;;  %s491_s2 = inlined_call_operand.vmem [shape: f32[1,128], index: 2, kind: input, shape index: {}]   ;;  %s492_s3 = inlined_call_operand.hbm [shape: bf16[128,128], index: 3, kind: input, shape index: {}]   ;;  %s493_s4 = inlined_call_operand.vmem [shape: f32[1,128], index: 4, kind: input, shape index: {}]   ;;  %s494_s5 = inlined_call_operand.vmem [shape: f32[16,128], index: 5, kind: output, shape index: {}]  }
   0x1   :  { %11 = vsyncpa [#allocation5], 0  ;;  %s429_s18 = smov [#allocation2]  }
   0x2   :  { %s19_s19 = sshll.u32 %s429_s18, 4  ;;  %s20_s19 = int_to_ptr.vmem [resolvable:$true] %s19_s19 }
   0x3   :  { %s393_s20 = scalar_lea.vmem %s20_s19, 1024  ;;  %p398_p1 = scmp.lt.s32.totalorder %s20_s19, %s20_s19 }
   0x4   :  { %p394_p0 = scmp.ne.s32.totalorder %s20_s19, %s393_s20  ;;  %p399_p2 = scmp.lt.s32.totalorder %s393_s20, %s393_s20 }
   0x6   :  { %p400_p3 = por %p399_p2, %p398_p1 }
   0x8   :  { %p401_p4 = pnand %p400_p3, %p394_p0 }
   0xa   :  { %404 = shalt.err (!%p401_p4)
}
   0xb   :  { %s430_s21 = smov 64   ;;  %s431_s22 = smov 4  }
   0xc   :  { %25 = dma.hbm_to_vmem [thread:$0]  %s490_s1, 1024, %s20_s19, [#allocation3], %s430_s21, %s430_s21, %s431_s22  }
   0xd   :  { %s432_s25 = smov [#allocation4]  }
   0xe   :  { %s33_s26 = sshll.u32 %s432_s25, 4  ;;  %s34_s26 = int_to_ptr.vmem [resolvable:$true] %s33_s26 }
   0xf   :  { %s413_s27 = scalar_lea.vmem %s34_s26, 1024  ;;  %p418_p6 = scmp.lt.s32.totalorder %s34_s26, %s34_s26 }
  0x10   :  { %p414_p5 = scmp.ne.s32.totalorder %s34_s26, %s413_s27  ;;  %p419_p7 = scmp.lt.s32.totalorder %s413_s27, %s413_s27 }
  0x12   :  { %p420_p8 = por %p419_p7, %p418_p6 }
  0x14   :  { %p421_p9 = pnand %p420_p8, %p414_p5 }
  0x16   :  { %424 = shalt.err (!%p421_p9)
}
  0x17   :  { %39 = dma.hbm_to_vmem [thread:$0]  %s492_s3, 1024, %s34_s26, [#allocation5], %s430_s21, %s430_s21, %s431_s22  }
  0x18   :  { %425 = dma.done.wait [#allocation3], 1024  }
  0x19   :  { %426 = vsyncadd [#allocation3], 4294966272 }
  0x1a   :  { %427 = dma.done.wait [#allocation5], 1024  }
  0x1b   :  { %428 = vsyncadd [#allocation5], 4294966272  ;;  %v433_v0 = vmov 0.0   ;;  %vm434_vm0 = vmmov 0   ;;  %v369_v1 = vld [vmem:[#allocation2 + $0x38] sm:$0xff]   ;;  %v370_v2 = vld [vmem:[#allocation2 + $0x30] sm:$0xff]  }
  0x1c   :  { %323 = vmatprep.subr.bf16.mxu0 %v433_v0  ;;  %339 = vmatprep.mubr.msk.bf16.mxu0 %vm434_vm0, %v433_v0  ;;  %v371_v3 = vld [vmem:[#allocation2 + $0x28] sm:$0xff]   ;;  %v377_v4 = vld [vmem:[#allocation4 + $0x38] sm:$0xff]   ;;  %v372_v5 = vld [vmem:[#allocation2 + $0x20] sm:$0xff]  }
  0x1d   :  { %343 = vmatprep.subr.bf16.mxu1 %v433_v0  ;;  %359 = vmatprep.mubr.msk.bf16.mxu1 %vm434_vm0, %v433_v0  ;;  %v378_v6 = vld [vmem:[#allocation4 + $0x30] sm:$0xff]   ;;  %v373_v7 = vld [vmem:[#allocation2 + $0x18] sm:$0xff]   ;;  %v379_v8 = vld [vmem:[#allocation4 + $0x28] sm:$0xff]  }
  0x1e   :  { %324 = vmatpush3.bf16.msra.mxu0 %v369_v1  ;;  %344 = vmatpush3.bf16.msra.mxu1 %v377_v4  ;;  %v374_v9 = vld [vmem:[#allocation2 + $0x10] sm:$0xff]   ;;  %v380_v10 = vld [vmem:[#allocation4 + $0x20] sm:$0xff]   ;;  %v375_v11 = vld [vmem:[#allocation2 + $0x8] sm:$0xff]  }
  0x1f   :  { %325 = vmatprep.subr.bf16.mxu0 %v433_v0  ;;  %345 = vmatprep.subr.bf16.mxu1 %v433_v0  ;;  %v381_v12 = vld [vmem:[#allocation4 + $0x18] sm:$0xff]   ;;  %v376_v13 = vld [vmem:[#allocation2] sm:$0xff]   ;;  %v50_v15 = vld [vmem:[%s489_s0 + $0x8] sm:$0xff] }
  0x20   :  { %v49_v14 = vld [vmem:[%s489_s0] sm:$0xff]  ;;  %v382_v17 = vld [vmem:[#allocation4 + $0x10] sm:$0xff]   ;;  %v383_v18 = vld [vmem:[#allocation4 + $0x8] sm:$0xff]  }
  0x21   :  { %v51_v16 = vpack.c.bf16 %v50_v15, %v49_v14  ;;  %v384_v19 = vld [vmem:[#allocation4] sm:$0xff]  }
  0x22   :  { %326 = vmatpush3.bf16.msra.mxu0 %v370_v2  ;;  %346 = vmatpush3.bf16.msra.mxu1 %v378_v6  ;;  %v287_v20 = vld [vmem:[%s491_s2] ss:$0 sm:$0xff] }
  0x23   :  { %327 = vmatprep.subr.bf16.mxu0 %v433_v0  ;;  %347 = vmatprep.subr.bf16.mxu1 %v433_v0  ;;  %v296_v30 = vld [vmem:[%s493_s4] ss:$0 sm:$0xff] }
  0x26   :  { %328 = vmatpush3.bf16.msra.mxu0 %v371_v3  ;;  %348 = vmatpush3.bf16.msra.mxu1 %v379_v8 }
  0x27   :  { %329 = vmatprep.subr.bf16.mxu0 %v433_v0  ;;  %349 = vmatprep.subr.bf16.mxu1 %v433_v0 }
  0x2a   :  { %330 = vmatpush3.bf16.msra.mxu0 %v372_v5  ;;  %350 = vmatpush3.bf16.msra.mxu1 %v380_v10 }
  0x2b   :  { %331 = vmatprep.subr.bf16.mxu0 %v433_v0  ;;  %351 = vmatprep.subr.bf16.mxu1 %v433_v0 }
  0x2e   :  { %332 = vmatpush3.bf16.msra.mxu0 %v373_v7  ;;  %352 = vmatpush3.bf16.msra.mxu1 %v381_v12 }
  0x2f   :  { %333 = vmatprep.subr.bf16.mxu0 %v433_v0  ;;  %353 = vmatprep.subr.bf16.mxu1 %v433_v0 }
  0x32   :  { %334 = vmatpush3.bf16.msra.mxu0 %v374_v9  ;;  %354 = vmatpush3.bf16.msra.mxu1 %v382_v17 }
  0x33   :  { %335 = vmatprep.subr.bf16.mxu0 %v433_v0  ;;  %355 = vmatprep.subr.bf16.mxu1 %v433_v0 }
  0x36   :  { %336 = vmatpush3.bf16.msra.mxu0 %v375_v11  ;;  %356 = vmatpush3.bf16.msra.mxu1 %v383_v18 }
  0x37   :  { %337 = vmatprep.subr.bf16.mxu0 %v433_v0  ;;  %357 = vmatprep.subr.bf16.mxu1 %v433_v0 }
  0x3a   :  { %338 = vmatpush3.bf16.msra.mxu0 %v376_v13  ;;  %358 = vmatpush3.bf16.msra.mxu1 %v384_v19 }
  0x3d   :  { %340 = vmatmul.mubr.bf16.vlgmr.msra.gmra.mxu0 %v51_v16 }
  0xfd   :  { %v157_v21 = vpop.f32.mrf.mxu0 }
  0xfe   :  { %v158_v23 = vadd.f32 %v287_v20, %v157_v21 }
  0xff   :  { %v341_v22 = vpop.f32.mrf.mxu0 }
 0x100   :  { %v164_v27 = vmax.f32 %v158_v23, 0.0 }
 0x101   :  { %v160_v24 = vpop.f32.mrf.mxu0 }
 0x102   :  { %v161_v25 = vadd.f32 %v287_v20, %v160_v24 }
 0x103   :  { %v342_v26 = vpop.f32.mrf.mxu0 }
 0x104   :  { %v165_v28 = vmax.f32 %v161_v25, 0.0 }
 0x106   :  { %v166_v29 = vpack.c.bf16 %v165_v28, %v164_v27 }
 0x108   :  { %360 = vmatmul.mubr.bf16.vlgmr.msra.gmra.mxu1 %v166_v29 }
 0x1c8   :  { %v272_v31 = vpop.f32.mrf.mxu1 }
 0x1c9   :  { %v273_v32 = vadd.f32 %v296_v30, %v272_v31 }
 0x1ca   :  { %v361_v33 = vpop.f32.mrf.mxu1 }
 0x1cb   :  { %279 = vst [vmem:[%s494_s5] sm:$0xff] %v273_v32 }
 0x1cc   :  { %v275_v34 = vpop.f32.mrf.mxu1 }
 0x1cd   :  { %v276_v35 = vadd.f32 %v296_v30, %v275_v34 }
 0x1ce   :  { %v362_v36 = vpop.f32.mrf.mxu1 }
 0x1cf   :  { %280 = vst [vmem:[%s494_s5 + $0x8] sm:$0xff] %v276_v35 }
 0x1d0   :  { %285 = vsyncpa [#allocation3], 1 }
 0x1d1   :  { %286 = vsyncpa [#allocation5], 1 }

</bundles_post_ra>
